<compile_context>
chip_gen: v6e
topology: v6e:2x2x1
jax: 0.10.0
libtpu: 0.0.40
codegen_flags: <defaults>
</compile_context>

<pallas_src>
import functools
import math

import jax
import jax.numpy as jnp
from jax.experimental import pallas as pl
from jax.experimental.pallas import tpu as pltpu


def make_pe_table(d_model: int, max_len: int = 5000,
                  dtype=jnp.float32) -> jnp.ndarray:
    """Sinusoidal table matching the PyTorch __init__, built ONCE in the model
    dtype.  Returns shape (max_len, d_model); the size-1 batch dim is dropped
    (broadcasting over batch happens inside the kernel)."""
    assert d_model % 2 == 0, "d_model must be even (same assumption as PyTorch)"
    position = jnp.arange(0, max_len, dtype=jnp.float32)[:, None]             # (L, 1)
    div_term = jnp.exp(
        jnp.arange(0, d_model, 2, dtype=jnp.float32) * (-math.log(10000.0) / d_model)
    )                                                                          # (D/2,)
    angles = position * div_term                                               # (L, D/2)
    pe = jnp.zeros((max_len, d_model), dtype=jnp.float32)
    pe = pe.at[:, 0::2].set(jnp.sin(angles))
    pe = pe.at[:, 1::2].set(jnp.cos(angles))
    return pe.astype(dtype)


# ----------------------------------------------------------------------------
# Kernel
# ----------------------------------------------------------------------------
def _pe_add_kernel(x_ref, pe_ref, o_ref, *, batch: int, lane_unroll: bool):
    # x_ref / o_ref: (TS, B*D) tile of the flattened input/output.
    # pe_ref       : (TS, D)   rows of the positional table.
    d = pe_ref.shape[1]
    if lane_unroll:
        # d is a multiple of 128: per-batch adds into 128-aligned lane slices.
        # No (TS, B*D) jnp.tile temporary -> more VMEM headroom for bigger tiles.
        pe = pe_ref[...]
        for b in range(batch):
            lo = b * d
            o_ref[:, lo:lo + d] = x_ref[:, lo:lo + d] + pe
    else:
        # Lane-aligned overall (B*D % 128 == 0) but d itself is not; keep the
        # tiled broadcast (temp cost is accounted in the tile-size budget).
        o_ref[...] = x_ref[...] + jnp.tile(pe_ref[...], (1, batch))


# ----------------------------------------------------------------------------
# Tiling heuristics
# ----------------------------------------------------------------------------
def _round_up(n: int, m: int) -> int:
    return ((n + m - 1) // m) * m


def _cdiv(a: int, b: int) -> int:
    return (a + b - 1) // b


def _tpu_generation_params() -> dict:
    """Best-effort chip detection; conservative (v5e-like) defaults on failure."""
    kind = ""
    try:
        kind = jax.devices()[0].device_kind.lower()
    except Exception:  # pragma: no cover - defensive
        pass
    if "v7" in kind or "tpu7" in kind:
        # 2 TensorCores/chip, 64 MiB physical VMEM, ~3.2 TB/s HBM.
        return dict(num_tc=2, tile_target=5 << 20, vmem_limit=48 << 20)
    if "v6" in kind:
        # 1 TC, 128 MiB physical VMEM (32 MiB scoped default).
        return dict(num_tc=1, tile_target=4 << 20, vmem_limit=48 << 20)
    # v5e / unknown: 1 TC, 16 MiB scoped default -> raise explicitly but stay modest.
    return dict(num_tc=1, tile_target=2 << 20, vmem_limit=32 << 20)


def _choose_tile_rows(seq_len: int, row_bytes: int, sublane: int,
                      target_bytes: int, num_tc: int) -> int:
    """Rows of the (S, B*D) slab per grid step.

    Per-step footprint ~= 2x x-tile (db) + 2x out-tile (db) + 2x pe-tile (db)
    + 1-2 tile-sized temporaries, i.e. ~6-8x the x-tile; the generation
    targets are chosen so 8x target stays below the vmem_limit passed to the
    compiler.  Rows are aligned to the dtype's sublane packing.  On single-TC
    chips a small slab stays a single block (no forced split); on 2-TC chips
    we aim for >=2 tiles per core and an even number of grid steps.
    """
    full = _round_up(max(seq_len, 1), sublane)
    rows = (target_bytes // max(row_bytes, 1)) // sublane * sublane
    rows = max(sublane, min(rows, full))

    if num_tc >= 2:
        min_steps = 2 * num_tc
        if _cdiv(seq_len, rows) < min_steps and full >= min_steps * sublane:
            rows = max(sublane, _round_up(_cdiv(seq_len, min_steps), sublane))
        # Best-effort: even step count so both cores are busy on the last wave.
        for _ in range(4):
            steps = _cdiv(seq_len, rows)
            if steps <= 1 or steps % 2 == 0:
                break
            rows = max(sublane, rows - sublane)
    return rows


# ----------------------------------------------------------------------------
# Wrapper
# ----------------------------------------------------------------------------
def positional_encoding_forward(x: jnp.ndarray, pe: jnp.ndarray) -> jnp.ndarray:
    """x: (S, B, D) (contiguous in this order); pe: (max_len, D) in x.dtype.

    Returns x + pe[:S][:, None, :]  (identical to the PyTorch forward).
    """
    S, B, D = x.shape
    max_len, d_model = pe.shape
    assert d_model == D, "pe table d_model mismatch"
    assert max_len >= S, "sequence longer than the positional table"
    assert pe.dtype == x.dtype, "build the pe table in the model dtype"

    lane_width = B * D
    if lane_width % 128 != 0:
        # Lane-narrow slab: every Pallas store would be a masked partial store
        # and the pallas_call fixed cost dominates; plain XLA is strictly faster.
        return x + pe[:S][:, None, :]

    itemsize = jnp.dtype(x.dtype).itemsize
    params = _tpu_generation_params()
    sublane = max(8, 32 // itemsize)          # 8 for f32, 16 for bf16, 32 for int8
    ts = _choose_tile_rows(S, lane_width * itemsize, sublane,
                           params["tile_target"], params["num_tc"])
    grid = (pl.cdiv(S, ts),)

    # Lane/sublane-dense presentation: zero-cost row-major view of (S, B, D).
    x2 = x.reshape(S, lane_width)

    kernel = functools.partial(_pe_add_kernel, batch=B,
                               lane_unroll=(D % 128 == 0))

    out2 = pl.pallas_call(
        kernel,
        out_shape=jax.ShapeDtypeStruct((S, lane_width), x.dtype),
        grid_spec=pltpu.PrefetchScalarGridSpec(
            num_scalar_prefetch=0,
            grid=grid,
            in_specs=[
                pl.BlockSpec((ts, lane_width), lambda s: (s, 0)),  # x rows
                pl.BlockSpec((ts, D), lambda s: (s, 0)),           # pe rows
            ],
            out_specs=pl.BlockSpec((ts, lane_width), lambda s: (s, 0)),
        ),
        compiler_params=pltpu.CompilerParams(
            # TODO(synk): on v7x, pltpu.CORE_PARALLEL on this axis may shard
            # the grid across both TensorCores more aggressively; kept as
            # "parallel" here for portability across generations.
            dimension_semantics=("parallel",),
            vmem_limit_bytes=params["vmem_limit"],
        ),
        cost_estimate=pl.CostEstimate(
            flops=S * B * D,
            transcendentals=0,
            bytes_accessed=2 * S * B * D * itemsize + S * D * itemsize,
        ),
    )(x2, pe)

    return out2.reshape(S, B, D)


if __name__ == "__main__":
    key = jax.random.PRNGKey(0)
    k1, k2 = jax.random.split(key)

    # 1) Lane-dense case (B*D % 128 == 0) -> exercises the Pallas kernel.
    S, B, D = 64, 2, 128
    x = jax.random.normal(k1, (S, B, D), dtype=jnp.float32)
    pe = make_pe_table(d_model=D, max_len=5000, dtype=x.dtype)
    out = jax.block_until_ready(positional_encoding_forward(x, pe))
    ref = x + pe[:S][:, None, :]
    assert out.shape == (S, B, D) and out.dtype == x.dtype
    assert jnp.allclose(out, ref, atol=1e-6, rtol=1e-6)

    # 2) Original tiny module config (S=8, B=2, D=32): lane-narrow -> XLA fallback.
    S2, B2, D2 = 8, 2, 32
    x2 = jax.random.normal(k2, (S2, B2, D2), dtype=jnp.float32)
    pe2 = make_pe_table(d_model=D2, max_len=5000, dtype=x2.dtype)
    out2 = jax.block_until_ready(positional_encoding_forward(x2, pe2))
    ref2 = x2 + pe2[:S2][:, None, :]
    assert jnp.allclose(out2, ref2, atol=1e-6, rtol=1e-6)

    # 3) bf16 path (16-row sublane packing) through the Pallas kernel.
    S3, B3, D3 = 48, 2, 128
    x3 = jax.random.normal(k1, (S3, B3, D3), dtype=jnp.bfloat16)
    pe3 = make_pe_table(d_model=D3, max_len=5000, dtype=jnp.bfloat16)
    out3 = jax.block_until_ready(positional_encoding_forward(x3, pe3))
    ref3 = x3 + pe3[:S3][:, None, :]
    assert out3.dtype == jnp.bfloat16
    assert jnp.allclose(out3.astype(jnp.float32), ref3.astype(jnp.float32),
                        atol=1e-2, rtol=1e-2)

    print("KERNEL_OK")
</pallas_src>

<mosaic_0001>
module attributes {stable_mosaic.version = 11 : i64} {
  func.func @_pe_add_kernel(%arg0: i32, %arg1: memref<64x256xf32, #tpu.memory_space<vmem>>, %arg2: memref<64x128xf32, #tpu.memory_space<vmem>>, %arg3: memref<64x256xf32, #tpu.memory_space<vmem>>) attributes {dimension_semantics = [#tpu.dimension_semantics<parallel>], iteration_bounds = array<i64: 1>, scalar_prefetch = 0 : i64, scratch_operands = 0 : i64, tpu.core_type = #tpu.core_type<tc>, window_params = [{transform_indices = @transform_0, window_bounds = array<i64: 64, 256>}, {transform_indices = @transform_1, window_bounds = array<i64: 64, 128>}, {transform_indices = @transform_2, window_bounds = array<i64: 64, 256>}]} {
    %c0 = arith.constant 0 : index
    %c0_0 = arith.constant 0 : index
    %0 = vector.load %arg2[%c0, %c0_0] : memref<64x128xf32, #tpu.memory_space<vmem>>, vector<64x128xf32>
    %c0_1 = arith.constant 0 : index
    %c0_2 = arith.constant 0 : index
    %1 = vector.load %arg1[%c0_1, %c0_2] : memref<64x256xf32, #tpu.memory_space<vmem>>, vector<64x128xf32>
    %2 = arith.addf %1, %0 : vector<64x128xf32>
    %c0_3 = arith.constant 0 : index
    %c0_4 = arith.constant 0 : index
    %3 = vector.load %arg3[%c0_3, %c0_4] : memref<64x256xf32, #tpu.memory_space<vmem>>, vector<64x128xf32>
    tpu.vector_store %arg3[%c0_3, %c0_4], %2 {strides = array<i32>} : memref<64x256xf32, #tpu.memory_space<vmem>>, vector<64x128xf32>,
    %c0_5 = arith.constant 0 : index
    %c128 = arith.constant 128 : index
    %4 = vector.load %arg1[%c0_5, %c128] : memref<64x256xf32, #tpu.memory_space<vmem>>, vector<64x128xf32>
    %5 = arith.addf %4, %0 : vector<64x128xf32>
    %c0_6 = arith.constant 0 : index
    %c128_7 = arith.constant 128 : index
    %6 = vector.load %arg3[%c0_6, %c128_7] : memref<64x256xf32, #tpu.memory_space<vmem>>, vector<64x128xf32>
    tpu.vector_store %arg3[%c0_6, %c128_7], %5 {strides = array<i32>} : memref<64x256xf32, #tpu.memory_space<vmem>>, vector<64x128xf32>,
    return
  }
  func.func @transform_0(%arg0: i32) -> (i32, i32) {
    %c0_i32 = arith.constant 0 : i32
    %c0_i32_0 = arith.constant 0 : i32
    return %arg0, %c0_i32 : i32, i32
  }
  func.func @transform_1(%arg0: i32) -> (i32, i32) {
    %c0_i32 = arith.constant 0 : i32
    %c0_i32_0 = arith.constant 0 : i32
    return %arg0, %c0_i32 : i32, i32
  }
  func.func @transform_2(%arg0: i32) -> (i32, i32) {
    %c0_i32 = arith.constant 0 : i32
    %c0_i32_0 = arith.constant 0 : i32
    return %arg0, %c0_i32 : i32, i32
  }
}

</mosaic_0001>

<bundles_post_ra>
// kernel: tpu_custom_call.1
= control target key start
LH: loop header
LB: loop body
LE: loop exit
PB: predicated region body
PF: predicated region fallthrough
CT: control target
= control target key end

     0   :  { %7 = vsyncpa [#allocation3], 0  ;;  %s224_s0 = inlined_call_operand.hbm [shape: f32[64,256], index: 0, kind: input, shape index: {}]   ;;  %s225_s1 = inlined_call_operand.hbm [shape: f32[5000,128], index: 1, kind: input, shape index: {}]   ;;  %s226_s2 = inlined_call_operand.hbm [shape: f32[64,256], index: 2, kind: output, shape index: {}]  }
   0x1   :  { %8 = vsyncpa [#allocation6], 0 }
   0x2   :  { %9 = vsyncpa [#allocation4], 0  ;;  %s187_s9 = smov [#allocation2]  }
   0x3   :  { %s15_s10 = sshll.u32 %s187_s9, 4  ;;  %s16_s10 = int_to_ptr.vmem [resolvable:$true] %s15_s10 }
   0x4   :  { %s129_s11 = scalar_lea.vmem %s16_s10, 2048  ;;  %p134_p1 = scmp.lt.s32.totalorder %s16_s10, %s16_s10 }
   0x5   :  { %p130_p0 = scmp.ne.s32.totalorder %s16_s10, %s129_s11  ;;  %p135_p2 = scmp.lt.s32.totalorder %s129_s11, %s129_s11 }
   0x7   :  { %p136_p3 = por %p135_p2, %p134_p1 }
   0x9   :  { %p137_p4 = pnand %p136_p3, %p130_p0 }
   0xb   :  { %140 = shalt.err (!%p137_p4)
}
   0xc   :  { %s188_s12 = smov 256   ;;  %s189_s13 = smov 16  }
   0xd   :  { %21 = dma.hbm_to_vmem [thread:$0]  %s224_s0, 2048, %s16_s10, [#allocation3], %s188_s12, %s188_s12, %s189_s13  }
   0xe   :  { %s190_s16 = smov [#allocation5]  }
   0xf   :  { %s27_s17 = sshll.u32 %s190_s16, 4  ;;  %s28_s17 = int_to_ptr.vmem [resolvable:$true] %s27_s17 }
  0x10   :  { %s149_s18 = scalar_lea.vmem %s28_s17, 1024  ;;  %p154_p6 = scmp.lt.s32.totalorder %s28_s17, %s28_s17 }
  0x11   :  { %p150_p5 = scmp.ne.s32.totalorder %s28_s17, %s149_s18  ;;  %p155_p7 = scmp.lt.s32.totalorder %s149_s18, %s149_s18 }
  0x13   :  { %p156_p8 = por %p155_p7, %p154_p6 }
  0x15   :  { %p157_p9 = pnand %p156_p8, %p150_p5 }
  0x17   :  { %160 = shalt.err (!%p157_p9)
}
  0x18   :  { %s191_s19 = smov 128   ;;  %s192_s20 = smov 8  }
  0x19   :  { %33 = dma.hbm_to_vmem [thread:$0]  %s225_s1, 1024, %s28_s17, [#allocation6], %s191_s19, %s191_s19, %s192_s20  }
  0x1a   :  { %181 = dma.done.wait [#allocation3], 2048  }
  0x1b   :  { %182 = vsyncadd [#allocation3], 4294965248 }
  0x1c   :  { %183 = dma.done.wait [#allocation6], 1024  }
  0x1d   :  { %184 = vsyncadd [#allocation6], 4294966272  ;;  %v40_v0 = vld [vmem:[#allocation5] sm:$0xff]  ;;  %v41_v2 = vld [vmem:[#allocation5 + $0x8] sm:$0xff]  ;;  %s193_s0 = smov [#allocation7]  }
  0x1e   :  { %v48_v1 = vld [vmem:[#allocation2] sm:$0xff]  ;;  %v49_v4 = vld [vmem:[#allocation2 + $0x10] sm:$0xff]  ;;  %v43_v9 = vld [vmem:[#allocation5 + $0x18] sm:$0xff]  ;;  %s101_s1 = sshll.u32 %s193_s0, 4  ;;  %s102_s1 = int_to_ptr.vmem [resolvable:$true] %s101_s1 }
  0x1f   :  { %v56_v3 = vadd.f32 %v48_v1, %v40_v0  ;;  %v42_v5 = vld [vmem:[#allocation5 + $0x10] sm:$0xff]  ;;  %v50_v6 = vld [vmem:[#allocation2 + $0x20] sm:$0xff]  ;;  %v57_v7 = vadd.f32 %v49_v4, %v41_v2  ;;  %v45_v14 = vld [vmem:[#allocation5 + $0x28] sm:$0xff]  ;;  %s161_s23 = scalar_lea.vmem %s102_s1, 2048  ;;  %p166_p11 = scmp.lt.s32.totalorder %s102_s1, %s102_s1 }
  0x20   :  { %v58_v8 = vadd.f32 %v50_v6, %v42_v5  ;;  %v51_v10 = vld [vmem:[#allocation2 + $0x30] sm:$0xff]  ;;  %v44_v11 = vld [vmem:[#allocation5 + $0x20] sm:$0xff]  ;;  %v47_v20 = vld [vmem:[#allocation5 + $0x38] sm:$0xff]  ;;  %p162_p10 = scmp.ne.s32.totalorder %s102_s1, %s161_s23  ;;  %p167_p12 = scmp.lt.s32.totalorder %s161_s23, %s161_s23 }
  0x21   :  { %64 = vst [vmem:[#allocation7] sm:$0xff] %v56_v3  ;;  %v59_v12 = vadd.f32 %v51_v10, %v43_v9  ;;  %v52_v13 = vld [vmem:[#allocation2 + $0x40] sm:$0xff]  ;;  %v53_v15 = vld [vmem:[#allocation2 + $0x50] sm:$0xff]  ;;  %65 = vst [vmem:[#allocation7 + $0x10] sm:$0xff] %v57_v7 }
  0x22   :  { %66 = vst [vmem:[#allocation7 + $0x20] sm:$0xff] %v58_v8  ;;  %v60_v16 = vadd.f32 %v52_v13, %v44_v11  ;;  %v61_v17 = vadd.f32 %v53_v15, %v45_v14  ;;  %v46_v18 = vld [vmem:[#allocation5 + $0x30] sm:$0xff]  ;;  %v54_v19 = vld [vmem:[#allocation2 + $0x60] sm:$0xff]  ;;  %v72_v23 = vld [vmem:[#allocation2 + $0x8] sm:$0xff]  ;;  %p168_p13 = por %p167_p12, %p166_p11 }
  0x23   :  { %67 = vst [vmem:[#allocation7 + $0x30] sm:$0xff] %v59_v12  ;;  %v62_v21 = vadd.f32 %v54_v19, %v46_v18  ;;  %v55_v22 = vld [vmem:[#allocation2 + $0x70] sm:$0xff]  ;;  %v73_v24 = vld [vmem:[#allocation2 + $0x18] sm:$0xff]  ;;  %v80_v26 = vadd.f32 %v72_v23, %v40_v0  ;;  %v74_v28 = vld [vmem:[#allocation2 + $0x28] sm:$0xff] }
  0x24   :  { %68 = vst [vmem:[#allocation7 + $0x40] sm:$0xff] %v60_v16  ;;  %69 = vst [vmem:[#allocation7 + $0x50] sm:$0xff] %v61_v17  ;;  %v63_v25 = vadd.f32 %v55_v22, %v47_v20  ;;  %v81_v27 = vadd.f32 %v73_v24, %v41_v2  ;;  %v75_v29 = vld [vmem:[#allocation2 + $0x38] sm:$0xff]  ;;  %v76_v30 = vld [vmem:[#allocation2 + $0x48] sm:$0xff]  ;;  %v82_v31 = vadd.f32 %v74_v28, %v42_v5  ;;  %p169_p0 = pnand %p168_p13, %p162_p10 }
  0x25   :  { %70 = vst [vmem:[#allocation7 + $0x60] sm:$0xff] %v62_v21  ;;  %v83_v32 = vadd.f32 %v75_v29, %v43_v9  ;;  %v84_v33 = vadd.f32 %v76_v30, %v44_v11  ;;  %v77_v34 = vld [vmem:[#allocation2 + $0x58] sm:$0xff]  ;;  %v78_v35 = vld [vmem:[#allocation2 + $0x68] sm:$0xff]  ;;  %88 = vst [vmem:[#allocation7 + $0x8] sm:$0xff] %v80_v26 }
  0x26   :  { %v79_v36 = vld [vmem:[#allocation2 + $0x78] sm:$0xff]  ;;  %71 = vst [vmem:[#allocation7 + $0x70] sm:$0xff] %v63_v25  ;;  %89 = vst [vmem:[#allocation7 + $0x18] sm:$0xff] %v81_v27  ;;  %v85_v37 = vadd.f32 %v77_v34, %v45_v14  ;;  %v86_v38 = vadd.f32 %v78_v35, %v46_v18 }
  0x27   :  { %v87_v39 = vadd.f32 %v79_v36, %v47_v20  ;;  %90 = vst [vmem:[#allocation7 + $0x28] sm:$0xff] %v82_v31  ;;  %91 = vst [vmem:[#allocation7 + $0x38] sm:$0xff] %v83_v32 }
  0x28   :  { %92 = vst [vmem:[#allocation7 + $0x48] sm:$0xff] %v84_v33  ;;  %93 = vst [vmem:[#allocation7 + $0x58] sm:$0xff] %v85_v37 }
  0x29   :  { %94 = vst [vmem:[#allocation7 + $0x68] sm:$0xff] %v86_v38  ;;  %95 = vst [vmem:[#allocation7 + $0x78] sm:$0xff] %v87_v39 }
  0x2a   :  { %172 = shalt.err (!%p169_p0)
}
  0x2b   :  { %107 = dma.vmem_to_hbm [thread:$0]  %s102_s1, 2048, %s226_s2, [#allocation4], %s188_s12, %s188_s12, %s189_s13  }
  0x2c   :  { %185 = dma.done.wait [#allocation4], 2048  }
  0x2d   :  { %186 = vsyncadd [#allocation4], 4294965248 }
  0x2e   :  { %111 = vsyncpa [#allocation3], 1 }
  0x2f   :  { %112 = vsyncpa [#allocation6], 1 }
  0x30   :  { %113 = vsyncpa [#allocation4], 1 }

</bundles_post_ra>
